<compile_context>
chip_gen: v5e
topology: v5e:2x2
jax: 0.10.0
libtpu: 0.0.40
codegen_flags: <defaults>
</compile_context>

<pallas_src>
import functools

import jax
import jax.numpy as jnp
from jax.experimental import pallas as pl
from jax.experimental.pallas import tpu as pltpu

LANE = 128                      # TPU lane width; pad all last dims to this.
MATMUL_DTYPE = jnp.bfloat16     # MXU input dtype (set to jnp.float32 for exact f32).


# ----------------------------------------------------------------------------
# Fused kernel: whole forward pass, single invocation, everything in VMEM.
# ----------------------------------------------------------------------------

def _fused_gcn_kernel(a_ref, x_ref,
                      wr_ref, br_ref,
                      w1_ref, b1_ref,
                      w2_ref, b2_ref,
                      w3_ref, b3_ref,
                      w4_ref, b4_ref,
                      wo_ref, bo_ref,
                      o_ref, *, layer_dims, matmul_dtype):
    def mm(p, q):
        # bf16 MXU inputs, f32 accumulation.
        return jnp.dot(p.astype(matmul_dtype), q.astype(matmul_dtype),
                       preferred_element_type=jnp.float32)

    a = a_ref[...].astype(matmul_dtype)   # cast the normalised adjacency once
    x = x_ref[...]

    def gcn_layer(h, w_ref, b_ref, f_in, f_out):
        # out = A_norm @ h @ W + b, associativity chosen from LOGICAL dims.
        w = w_ref[...]
        if f_out <= f_in:
            out = mm(a, mm(h, w))         # contract the small F first
        else:
            out = mm(mm(a, h), w)
        return out + b_ref[...]           # f32 epilogue

    # Residual projection.
    res = mm(x, wr_ref[...]) + br_ref[...]

    # conv1..conv3 (+ ReLU), conv4 fused with residual add (+ ReLU).
    h = jnp.maximum(gcn_layer(x, w1_ref, b1_ref, *layer_dims[0]), 0.0)
    h = jnp.maximum(gcn_layer(h, w2_ref, b2_ref, *layer_dims[1]), 0.0)
    h = jnp.maximum(gcn_layer(h, w3_ref, b3_ref, *layer_dims[2]), 0.0)
    h = jnp.maximum(gcn_layer(h, w4_ref, b4_ref, *layer_dims[3]) + res, 0.0)

    # Classifier (lane-dense padded output; real columns are sliced outside).
    o_ref[...] = mm(h, wo_ref[...]) + bo_ref[...]


# ----------------------------------------------------------------------------
# Glue: normalisation, padding, the pallas_call wrapper (all under one jit).
# ----------------------------------------------------------------------------

def normalize_adjacency(a_w):
    """Symmetric normalisation with weighted degrees (DGL norm='both').

    a_w[i, j] = edge weight j -> i.  Degrees clamped to >= 1 like DGL.
    """
    deg_in = jnp.clip(jnp.sum(a_w, axis=1), 1.0)
    deg_out = jnp.clip(jnp.sum(a_w, axis=0), 1.0)
    return a_w * (1.0 / jnp.sqrt(deg_in))[:, None] * (1.0 / jnp.sqrt(deg_out))[None, :]


def _round_up(n, m):
    return ((n + m - 1) // m) * m


def _pad2d(x, rows, cols):
    r, c = x.shape
    return jnp.pad(x, ((0, rows - r), (0, cols - c)))


def gcn_forward(params, a_w, inputs):
    n, in_feats = inputs.shape
    h_dims = [params[k][0].shape[1] for k in ("conv1", "conv2", "conv3", "conv4")]
    num_classes = params["op"][0].shape[1]
    dims = [in_feats] + h_dims

    n_pad = _round_up(n, LANE)
    f_pad = _round_up(max(dims + [num_classes, params["residual"][0].shape[1]]), LANE)

    # Normalise + zero-pad everything to lane-dense shapes (zero padding is
    # exact: padded rows/cols never leak into the real (N, num_classes) block).
    a_p = _pad2d(normalize_adjacency(a_w), n_pad, n_pad)
    x_p = _pad2d(inputs, n_pad, f_pad)

    flat_params = []
    for name in ("residual", "conv1", "conv2", "conv3", "conv4", "op"):
        w, b = params[name]
        flat_params += [_pad2d(w, f_pad, f_pad), _pad2d(b, 1, f_pad)]

    layer_dims = tuple((dims[i], dims[i + 1]) for i in range(4))
    kernel = functools.partial(_fused_gcn_kernel,
                               layer_dims=layer_dims,
                               matmul_dtype=MATMUL_DTYPE)

    vmem = pl.BlockSpec(memory_space=pltpu.MemorySpace.VMEM)
    out_p = pl.pallas_call(
        kernel,
        out_shape=jax.ShapeDtypeStruct((n_pad, f_pad), jnp.float32),
        in_specs=[vmem] * (2 + len(flat_params)),
        out_specs=vmem,
    )(a_p, x_p, *flat_params)

    return out_p[:n, :num_classes]


gcn_forward_jit = jax.jit(gcn_forward)


# ----------------------------------------------------------------------------
# Pure-JAX reference (f32) for a loose numerical sanity check.
# ----------------------------------------------------------------------------

def reference_forward(params, a_w, inputs):
    a = normalize_adjacency(a_w)

    def lin(h, wb):
        w, b = wb
        return h @ w + b

    def gcn(h, wb):
        w, b = wb
        return a @ h @ w + b

    res = lin(inputs, params["residual"])
    h = jax.nn.relu(gcn(inputs, params["conv1"]))
    h = jax.nn.relu(gcn(h, params["conv2"]))
    h = jax.nn.relu(gcn(h, params["conv3"]))
    h = jax.nn.relu(gcn(h, params["conv4"]) + res)
    return lin(h, params["op"])


# ----------------------------------------------------------------------------
# Parameter init (PyTorch nn.Linear-style uniform, weights stored [F_in, F_out]).
# ----------------------------------------------------------------------------

def init_linear_params(key, fan_in, fan_out):
    kw, kb = jax.random.split(key)
    bound = 1.0 / jnp.sqrt(jnp.float32(fan_in))
    w = jax.random.uniform(kw, (fan_in, fan_out), jnp.float32, -bound, bound)
    b = jax.random.uniform(kb, (1, fan_out), jnp.float32, -bound, bound)
    return w, b


def init_model_params(key, in_feats, h1, h2, h3, h4, num_classes):
    keys = jax.random.split(key, 6)
    return {
        "residual": init_linear_params(keys[0], in_feats, h4),
        "conv1": init_linear_params(keys[1], in_feats, h1),
        "conv2": init_linear_params(keys[2], h1, h2),
        "conv3": init_linear_params(keys[3], h2, h3),
        "conv4": init_linear_params(keys[4], h3, h4),
        "op": init_linear_params(keys[5], h4, num_classes),
    }


# ----------------------------------------------------------------------------
# Driver
# ----------------------------------------------------------------------------

if __name__ == "__main__":
    N = 64
    IN_FEATS = 8
    H1, H2, H3, H4 = 16, 32, 32, 16
    NUM_CLASSES = 4

    key = jax.random.PRNGKey(0)
    k_feat, k_mask, k_ew, k_params = jax.random.split(key, 4)

    # Node features.
    inputs = jax.random.normal(k_feat, (N, IN_FEATS), jnp.float32)

    # Random weighted graph: ~30% density, positive edge weights, plus unit
    # self loops so no node has zero in/out degree.
    mask = (jax.random.uniform(k_mask, (N, N)) < 0.3).astype(jnp.float32)
    edge_weight = jax.random.uniform(k_ew, (N, N), jnp.float32, 0.1, 1.0)
    a_w = mask * edge_weight + jnp.eye(N, dtype=jnp.float32)

    params = init_model_params(k_params, IN_FEATS, H1, H2, H3, H4, NUM_CLASSES)

    out = jax.block_until_ready(gcn_forward_jit(params, a_w, inputs))

    assert out.shape == (N, NUM_CLASSES), out.shape
    assert bool(jnp.all(jnp.isfinite(out)))

    # Loose sanity check vs. a pure-JAX f32 reference (kernel uses bf16 MXU
    # inputs with f32 accumulation, so allow a generous tolerance).
    ref = reference_forward(params, a_w, inputs)
    max_err = float(jnp.max(jnp.abs(out - ref)))
    assert max_err < 0.25, f"max abs error vs reference: {max_err}"

    print("KERNEL_OK")
</pallas_src>

<mosaic_0001>
module attributes {stable_mosaic.version = 11 : i64} {
  func.func @_fused_gcn_kernel(%arg0: memref<128x128xf32, #tpu.memory_space<vmem>>, %arg1: memref<128x128xf32, #tpu.memory_space<vmem>>, %arg2: memref<128x128xf32, #tpu.memory_space<vmem>>, %arg3: memref<1x128xf32, #tpu.memory_space<vmem>>, %arg4: memref<128x128xf32, #tpu.memory_space<vmem>>, %arg5: memref<1x128xf32, #tpu.memory_space<vmem>>, %arg6: memref<128x128xf32, #tpu.memory_space<vmem>>, %arg7: memref<1x128xf32, #tpu.memory_space<vmem>>, %arg8: memref<128x128xf32, #tpu.memory_space<vmem>>, %arg9: memref<1x128xf32, #tpu.memory_space<vmem>>, %arg10: memref<128x128xf32, #tpu.memory_space<vmem>>, %arg11: memref<1x128xf32, #tpu.memory_space<vmem>>, %arg12: memref<128x128xf32, #tpu.memory_space<vmem>>, %arg13: memref<1x128xf32, #tpu.memory_space<vmem>>, %arg14: memref<128x128xf32, #tpu.memory_space<vmem>>) attributes {dimension_semantics = [], scalar_prefetch = 0 : i64, scratch_operands = 0 : i64, tpu.core_type = #tpu.core_type<tc>} {
    %c0 = arith.constant 0 : index
    %c0_0 = arith.constant 0 : index
    %0 = vector.load %arg0[%c0, %c0_0] : memref<128x128xf32, #tpu.memory_space<vmem>>, vector<128x128xf32>
    %1 = arith.truncf %0 : vector<128x128xf32> to vector<128x128xbf16>
    %c0_1 = arith.constant 0 : index
    %c0_2 = arith.constant 0 : index
    %2 = vector.load %arg1[%c0_1, %c0_2] : memref<128x128xf32, #tpu.memory_space<vmem>>, vector<128x128xf32>
    %c0_3 = arith.constant 0 : index
    %c0_4 = arith.constant 0 : index
    %3 = vector.load %arg2[%c0_3, %c0_4] : memref<128x128xf32, #tpu.memory_space<vmem>>, vector<128x128xf32>
    %4 = arith.truncf %2 : vector<128x128xf32> to vector<128x128xbf16>
    %5 = arith.truncf %3 : vector<128x128xf32> to vector<128x128xbf16>
    %cst = arith.constant dense<0.000000e+00> : vector<128x128xf32>
    %6 = tpu.matmul %4, %5, %cst {dimension_numbers = #tpu.dot_dimension_numbers<[1], [0], [0], [1], [0, 0, 1, 1], [], []>} : vector<128x128xbf16>, vector<128x128xbf16>, vector<128x128xf32> -> vector<128x128xf32>
    %c0_5 = arith.constant 0 : index
    %c0_6 = arith.constant 0 : index
    %7 = vector.load %arg3[%c0_5, %c0_6] : memref<1x128xf32, #tpu.memory_space<vmem>>, vector<1x128xf32>
    %8 = vector.broadcast %7 : vector<1x128xf32> to vector<128x128xf32>
    %9 = arith.addf %6, %8 : vector<128x128xf32>
    %c0_7 = arith.constant 0 : index
    %c0_8 = arith.constant 0 : index
    %10 = vector.load %arg4[%c0_7, %c0_8] : memref<128x128xf32, #tpu.memory_space<vmem>>, vector<128x128xf32>
    %11 = arith.truncf %2 : vector<128x128xf32> to vector<128x128xbf16>
    %cst_9 = arith.constant dense<0.000000e+00> : vector<128x128xf32>
    %12 = tpu.matmul %1, %11, %cst_9 {dimension_numbers = #tpu.dot_dimension_numbers<[1], [0], [0], [1], [0, 0, 1, 1], [], []>} : vector<128x128xbf16>, vector<128x128xbf16>, vector<128x128xf32> -> vector<128x128xf32>
    %13 = arith.truncf %12 : vector<128x128xf32> to vector<128x128xbf16>
    %14 = arith.truncf %10 : vector<128x128xf32> to vector<128x128xbf16>
    %cst_10 = arith.constant dense<0.000000e+00> : vector<128x128xf32>
    %15 = tpu.matmul %13, %14, %cst_10 {dimension_numbers = #tpu.dot_dimension_numbers<[1], [0], [0], [1], [0, 0, 1, 1], [], []>} : vector<128x128xbf16>, vector<128x128xbf16>, vector<128x128xf32> -> vector<128x128xf32>
    %c0_11 = arith.constant 0 : index
    %c0_12 = arith.constant 0 : index
    %16 = vector.load %arg5[%c0_11, %c0_12] : memref<1x128xf32, #tpu.memory_space<vmem>>, vector<1x128xf32>
    %17 = vector.broadcast %16 : vector<1x128xf32> to vector<128x128xf32>
    %18 = arith.addf %15, %17 : vector<128x128xf32>
    %cst_13 = arith.constant 0.000000e+00 : f32
    %19 = vector.broadcast %cst_13 : f32 to vector<128x128xf32>
    %20 = arith.maximumf %18, %19 : vector<128x128xf32>
    %c0_14 = arith.constant 0 : index
    %c0_15 = arith.constant 0 : index
    %21 = vector.load %arg6[%c0_14, %c0_15] : memref<128x128xf32, #tpu.memory_space<vmem>>, vector<128x128xf32>
    %22 = arith.truncf %20 : vector<128x128xf32> to vector<128x128xbf16>
    %cst_16 = arith.constant dense<0.000000e+00> : vector<128x128xf32>
    %23 = tpu.matmul %1, %22, %cst_16 {dimension_numbers = #tpu.dot_dimension_numbers<[1], [0], [0], [1], [0, 0, 1, 1], [], []>} : vector<128x128xbf16>, vector<128x128xbf16>, vector<128x128xf32> -> vector<128x128xf32>
    %24 = arith.truncf %23 : vector<128x128xf32> to vector<128x128xbf16>
    %25 = arith.truncf %21 : vector<128x128xf32> to vector<128x128xbf16>
    %cst_17 = arith.constant dense<0.000000e+00> : vector<128x128xf32>
    %26 = tpu.matmul %24, %25, %cst_17 {dimension_numbers = #tpu.dot_dimension_numbers<[1], [0], [0], [1], [0, 0, 1, 1], [], []>} : vector<128x128xbf16>, vector<128x128xbf16>, vector<128x128xf32> -> vector<128x128xf32>
    %c0_18 = arith.constant 0 : index
    %c0_19 = arith.constant 0 : index
    %27 = vector.load %arg7[%c0_18, %c0_19] : memref<1x128xf32, #tpu.memory_space<vmem>>, vector<1x128xf32>
    %28 = vector.broadcast %27 : vector<1x128xf32> to vector<128x128xf32>
    %29 = arith.addf %26, %28 : vector<128x128xf32>
    %cst_20 = arith.constant 0.000000e+00 : f32
    %30 = vector.broadcast %cst_20 : f32 to vector<128x128xf32>
    %31 = arith.maximumf %29, %30 : vector<128x128xf32>
    %c0_21 = arith.constant 0 : index
    %c0_22 = arith.constant 0 : index
    %32 = vector.load %arg8[%c0_21, %c0_22] : memref<128x128xf32, #tpu.memory_space<vmem>>, vector<128x128xf32>
    %33 = arith.truncf %31 : vector<128x128xf32> to vector<128x128xbf16>
    %34 = arith.truncf %32 : vector<128x128xf32> to vector<128x128xbf16>
    %cst_23 = arith.constant dense<0.000000e+00> : vector<128x128xf32>
    %35 = tpu.matmul %33, %34, %cst_23 {dimension_numbers = #tpu.dot_dimension_numbers<[1], [0], [0], [1], [0, 0, 1, 1], [], []>} : vector<128x128xbf16>, vector<128x128xbf16>, vector<128x128xf32> -> vector<128x128xf32>
    %36 = arith.truncf %35 : vector<128x128xf32> to vector<128x128xbf16>
    %cst_24 = arith.constant dense<0.000000e+00> : vector<128x128xf32>
    %37 = tpu.matmul %1, %36, %cst_24 {dimension_numbers = #tpu.dot_dimension_numbers<[1], [0], [0], [1], [0, 0, 1, 1], [], []>} : vector<128x128xbf16>, vector<128x128xbf16>, vector<128x128xf32> -> vector<128x128xf32>
    %c0_25 = arith.constant 0 : index
    %c0_26 = arith.constant 0 : index
    %38 = vector.load %arg9[%c0_25, %c0_26] : memref<1x128xf32, #tpu.memory_space<vmem>>, vector<1x128xf32>
    %39 = vector.broadcast %38 : vector<1x128xf32> to vector<128x128xf32>
    %40 = arith.addf %37, %39 : vector<128x128xf32>
    %cst_27 = arith.constant 0.000000e+00 : f32
    %41 = vector.broadcast %cst_27 : f32 to vector<128x128xf32>
    %42 = arith.maximumf %40, %41 : vector<128x128xf32>
    %c0_28 = arith.constant 0 : index
    %c0_29 = arith.constant 0 : index
    %43 = vector.load %arg10[%c0_28, %c0_29] : memref<128x128xf32, #tpu.memory_space<vmem>>, vector<128x128xf32>
    %44 = arith.truncf %42 : vector<128x128xf32> to vector<128x128xbf16>
    %45 = arith.truncf %43 : vector<128x128xf32> to vector<128x128xbf16>
    %cst_30 = arith.constant dense<0.000000e+00> : vector<128x128xf32>
    %46 = tpu.matmul %44, %45, %cst_30 {dimension_numbers = #tpu.dot_dimension_numbers<[1], [0], [0], [1], [0, 0, 1, 1], [], []>} : vector<128x128xbf16>, vector<128x128xbf16>, vector<128x128xf32> -> vector<128x128xf32>
    %47 = arith.truncf %46 : vector<128x128xf32> to vector<128x128xbf16>
    %cst_31 = arith.constant dense<0.000000e+00> : vector<128x128xf32>
    %48 = tpu.matmul %1, %47, %cst_31 {dimension_numbers = #tpu.dot_dimension_numbers<[1], [0], [0], [1], [0, 0, 1, 1], [], []>} : vector<128x128xbf16>, vector<128x128xbf16>, vector<128x128xf32> -> vector<128x128xf32>
    %c0_32 = arith.constant 0 : index
    %c0_33 = arith.constant 0 : index
    %49 = vector.load %arg11[%c0_32, %c0_33] : memref<1x128xf32, #tpu.memory_space<vmem>>, vector<1x128xf32>
    %50 = vector.broadcast %49 : vector<1x128xf32> to vector<128x128xf32>
    %51 = arith.addf %48, %50 : vector<128x128xf32>
    %52 = arith.addf %51, %9 : vector<128x128xf32>
    %cst_34 = arith.constant 0.000000e+00 : f32
    %53 = vector.broadcast %cst_34 : f32 to vector<128x128xf32>
    %54 = arith.maximumf %52, %53 : vector<128x128xf32>
    %c0_35 = arith.constant 0 : index
    %c0_36 = arith.constant 0 : index
    %55 = vector.load %arg12[%c0_35, %c0_36] : memref<128x128xf32, #tpu.memory_space<vmem>>, vector<128x128xf32>
    %56 = arith.truncf %54 : vector<128x128xf32> to vector<128x128xbf16>
    %57 = arith.truncf %55 : vector<128x128xf32> to vector<128x128xbf16>
    %cst_37 = arith.constant dense<0.000000e+00> : vector<128x128xf32>
    %58 = tpu.matmul %56, %57, %cst_37 {dimension_numbers = #tpu.dot_dimension_numbers<[1], [0], [0], [1], [0, 0, 1, 1], [], []>} : vector<128x128xbf16>, vector<128x128xbf16>, vector<128x128xf32> -> vector<128x128xf32>
    %c0_38 = arith.constant 0 : index
    %c0_39 = arith.constant 0 : index
    %59 = vector.load %arg13[%c0_38, %c0_39] : memref<1x128xf32, #tpu.memory_space<vmem>>, vector<1x128xf32>
    %60 = vector.broadcast %59 : vector<1x128xf32> to vector<128x128xf32>
    %61 = arith.addf %58, %60 : vector<128x128xf32>
    %c0_40 = arith.constant 0 : index
    %c0_41 = arith.constant 0 : index
    %62 = vector.load %arg14[%c0_40, %c0_41] : memref<128x128xf32, #tpu.memory_space<vmem>>, vector<128x128xf32>
    tpu.vector_store %arg14[%c0_40, %c0_41], %61 {strides = array<i32>} : memref<128x128xf32, #tpu.memory_space<vmem>>, vector<128x128xf32>,
    return
  }
}

</mosaic_0001>

<bundles_post_ra>
// kernel: gcn_forward.1
= control target key start
LH: loop header
LB: loop body
LE: loop exit
PB: predicated region body
PF: predicated region fallthrough
CT: control target
= control target key end

     0   :  { %s1636_s1 = inlined_call_operand.vmem [shape: f32[128,128], index: 1, kind: input, shape index: {}]   ;;  %s1637_s0 = inlined_call_operand.vmem [shape: f32[128,128], index: 0, kind: input, shape index: {}]   ;;  %s1638_s2 = inlined_call_operand.vmem [shape: f32[128,128], index: 2, kind: input, shape index: {}]   ;;  %s1639_s4 = inlined_call_operand.vmem [shape: f32[128,128], index: 4, kind: input, shape index: {}]   ;;  %s1640_s3 = inlined_call_operand.vmem [shape: f32[1,128], index: 3, kind: input, shape index: {}]   ;;  %s1641_s5 = inlined_call_operand.vmem [shape: f32[1,128], index: 5, kind: input, shape index: {}]   ;;  %s1642_s6 = inlined_call_operand.vmem [shape: f32[128,128], index: 6, kind: input, shape index: {}]   ;;  %s1643_s7 = inlined_call_operand.vmem [shape: f32[1,128], index: 7, kind: input, shape index: {}]   ;;  %s1644_s8 = inlined_call_operand.vmem [shape: f32[128,128], index: 8, kind: input, shape index: {}]   ;;  %s1645_s9 = inlined_call_operand.vmem [shape: f32[1,128], index: 9, kind: input, shape index: {}]   ;;  %s1646_s10 = inlined_call_operand.vmem [shape: f32[128,128], index: 10, kind: input, shape index: {}]   ;;  %s1647_s11 = inlined_call_operand.vmem [shape: f32[1,128], index: 11, kind: input, shape index: {}]   ;;  %s1648_s12 = inlined_call_operand.vmem [shape: f32[128,128], index: 12, kind: input, shape index: {}]   ;;  %s1649_s13 = inlined_call_operand.vmem [shape: f32[1,128], index: 13, kind: input, shape index: {}]   ;;  %s1650_s14 = inlined_call_operand.vmem [shape: f32[128,128], index: 14, kind: output, shape index: {}]  }
   0x1   :  { %v85_v0 = vld [vmem:[%s1636_s1 + $0x70] sm:$0xff]  ;;  %v86_v1 = vld [vmem:[%s1636_s1 + $0x78] sm:$0xff]  ;;  %v83_v2 = vld [vmem:[%s1636_s1 + $0x60] sm:$0xff] }
   0x2   :  { %v1023_v3 = vpack.c.bf16 %v86_v1, %v85_v0  ;;  %v84_v4 = vld [vmem:[%s1636_s1 + $0x68] sm:$0xff]  ;;  %v81_v6 = vld [vmem:[%s1636_s1 + $0x50] sm:$0xff]  ;;  %v82_v7 = vld [vmem:[%s1636_s1 + $0x58] sm:$0xff] }
   0x3   :  { %v1029_v5 = vpack.c.bf16 %v84_v4, %v83_v2  ;;  %v1039_v8 = vpack.c.bf16 %v82_v7, %v81_v6  ;;  %v79_v9 = vld [vmem:[%s1636_s1 + $0x40] sm:$0xff]  ;;  %v80_v10 = vld [vmem:[%s1636_s1 + $0x48] sm:$0xff]  ;;  %v77_v12 = vld [vmem:[%s1636_s1 + $0x30] sm:$0xff] }
   0x4   :  { %188 = vmatpush.bf16.msra.mxu1 %v1023_v3  ;;  %925 = vmatpush.bf16.msra.mxu3 %v1023_v3  ;;  %v1049_v11 = vpack.c.bf16 %v80_v10, %v79_v9  ;;  %v78_v13 = vld [vmem:[%s1636_s1 + $0x38] sm:$0xff]  ;;  %v75_v15 = vld [vmem:[%s1636_s1 + $0x20] sm:$0xff]  ;;  %v76_v16 = vld [vmem:[%s1636_s1 + $0x28] sm:$0xff] }
   0x5   :  { %v1059_v14 = vpack.c.bf16 %v78_v13, %v77_v12  ;;  %v1069_v17 = vpack.c.bf16 %v76_v16, %v75_v15  ;;  %v73_v18 = vld [vmem:[%s1636_s1 + $0x10] sm:$0xff]  ;;  %v74_v19 = vld [vmem:[%s1636_s1 + $0x18] sm:$0xff]  ;;  %v71_v21 = vld [vmem:[%s1636_s1] sm:$0xff] }
   0x6   :  { %v1079_v20 = vpack.c.bf16 %v74_v19, %v73_v18  ;;  %v72_v22 = vld [vmem:[%s1636_s1 + $0x8] sm:$0xff]  ;;  %v47_v24 = vld [vmem:[%s1637_s0] sm:$0xff]  ;;  %v101_v27 = vld [vmem:[%s1638_s2 + $0x70] sm:$0xff] }
   0x7   :  { %v1089_v23 = vpack.c.bf16 %v72_v22, %v71_v21  ;;  %v48_v25 = vld [vmem:[%s1637_s0 + $0x8] sm:$0xff]  ;;  %v102_v28 = vld [vmem:[%s1638_s2 + $0x78] sm:$0xff]  ;;  %v99_v30 = vld [vmem:[%s1638_s2 + $0x60] sm:$0xff] }
   0x8   :  { %189 = vmatpush.bf16.msra.mxu1 %v1029_v5  ;;  %926 = vmatpush.bf16.msra.mxu3 %v1029_v5  ;;  %v1098_v26 = vpack.c.bf16 %v48_v25, %v47_v24  ;;  %v118_v29 = vpack.c.bf16 %v102_v28, %v101_v27  ;;  %v100_v31 = vld [vmem:[%s1638_s2 + $0x68] sm:$0xff]  ;;  %v97_v33 = vld [vmem:[%s1638_s2 + $0x50] sm:$0xff]  ;;  %v98_v34 = vld [vmem:[%s1638_s2 + $0x58] sm:$0xff] }
   0x9   :  { %v117_v32 = vpack.c.bf16 %v100_v31, %v99_v30  ;;  %v116_v35 = vpack.c.bf16 %v98_v34, %v97_v33  ;;  %v95_v36 = vld [vmem:[%s1638_s2 + $0x40] sm:$0xff]  ;;  %v96_v37 = vld [vmem:[%s1638_s2 + $0x48] sm:$0xff]  ;;  %v49_v38 = vld [vmem:[%s1637_s0 + $0x10] sm:$0xff] }
   0xa   :  { %917 = vmatpush.bf16.msra.mxu2 %v118_v29  ;;  %123 = vmatpush.bf16.msra.mxu0 %v118_v29  ;;  %v50_v39 = vld [vmem:[%s1637_s0 + $0x18] sm:$0xff]  ;;  %v115_v40 = vpack.c.bf16 %v96_v37, %v95_v36  ;;  %v93_v42 = vld [vmem:[%s1638_s2 + $0x30] sm:$0xff]  ;;  %v55_v45 = vld [vmem:[%s1637_s0 + $0x40] sm:$0xff] }
   0xb   :  { %v1133_v41 = vpack.c.bf16 %v50_v39, %v49_v38  ;;  %v94_v43 = vld [vmem:[%s1638_s2 + $0x38] sm:$0xff]  ;;  %v56_v46 = vld [vmem:[%s1637_s0 + $0x48] sm:$0xff]  ;;  %v91_v48 = vld [vmem:[%s1638_s2 + $0x20] sm:$0xff] }
   0xc   :  { %190 = vmatpush.bf16.msra.mxu1 %v1039_v8  ;;  %927 = vmatpush.bf16.msra.mxu3 %v1039_v8  ;;  %v114_v44 = vpack.c.bf16 %v94_v43, %v93_v42  ;;  %v1148_v47 = vpack.c.bf16 %v56_v46, %v55_v45  ;;  %v92_v49 = vld [vmem:[%s1638_s2 + $0x28] sm:$0xff]  ;;  %v89_v51 = vld [vmem:[%s1638_s2 + $0x10] sm:$0xff]  ;;  %v90_v52 = vld [vmem:[%s1638_s2 + $0x18] sm:$0xff] }
   0xd   :  { %v113_v50 = vpack.c.bf16 %v92_v49, %v91_v48  ;;  %v112_v53 = vpack.c.bf16 %v90_v52, %v89_v51  ;;  %v87_v54 = vld [vmem:[%s1638_s2] sm:$0xff]  ;;  %v88_v55 = vld [vmem:[%s1638_s2 + $0x8] sm:$0xff]  ;;  %v57_v59 = vld [vmem:[%s1637_s0 + $0x50] sm:$0xff] }
   0xe   :  { %918 = vmatpush.bf16.msra.mxu2 %v117_v32  ;;  %124 = vmatpush.bf16.msra.mxu0 %v117_v32  ;;  %v51_v56 = vld [vmem:[%s1637_s0 + $0x20] sm:$0xff]  ;;  %v52_v57 = vld [vmem:[%s1637_s0 + $0x28] sm:$0xff]  ;;  %v111_v58 = vpack.c.bf16 %v88_v55, %v87_v54  ;;  %v58_v60 = vld [vmem:[%s1637_s0 + $0x58] sm:$0xff] }
   0xf   :  { %v1181_v61 = vpack.c.bf16 %v52_v57, %v51_v56  ;;  %v1183_v62 = vpack.c.bf16 %v58_v60, %v57_v59  ;;  %v186_v63 = vld [vmem:[%s1639_s4 + $0x70] sm:$0xff]  ;;  %v187_v0 = vld [vmem:[%s1639_s4 + $0x78] sm:$0xff]  ;;  %v184_v1 = vld [vmem:[%s1639_s4 + $0x60] sm:$0xff] }
  0x10   :  { %191 = vmatpush.bf16.msra.mxu1 %v1049_v11  ;;  %928 = vmatpush.bf16.msra.mxu3 %v1049_v11  ;;  %v252_v2 = vpack.c.bf16 %v187_v0, %v186_v63  ;;  %v185_v4 = vld [vmem:[%s1639_s4 + $0x68] sm:$0xff]  ;;  %v53_v7 = vld [vmem:[%s1637_s0 + $0x30] sm:$0xff]  ;;  %v54_v9 = vld [vmem:[%s1637_s0 + $0x38] sm:$0xff] }
  0x11   :  { %v251_v6 = vpack.c.bf16 %v185_v4, %v184_v1  ;;  %v59_v10 = vld [vmem:[%s1637_s0 + $0x60] sm:$0xff]  ;;  %v1213_v12 = vpack.c.bf16 %v54_v9, %v53_v7  ;;  %v182_v15 = vld [vmem:[%s1639_s4 + $0x50] sm:$0xff]  ;;  %v183_v16 = vld [vmem:[%s1639_s4 + $0x58] sm:$0xff] }
  0x12   :  { %919 = vmatpush.bf16.msra.mxu2 %v116_v35  ;;  %125 = vmatpush.bf16.msra.mxu0 %v116_v35  ;;  %v180_v18 = vld [vmem:[%s1639_s4 + $0x40] sm:$0xff]  ;;  %v250_v19 = vpack.c.bf16 %v183_v16, %v182_v15  ;;  %v181_v21 = vld [vmem:[%s1639_s4 + $0x48] sm:$0xff]  ;;  %v178_v22 = vld [vmem:[%s1639_s4 + $0x30] sm:$0xff] }
  0x13   :  { %v61_v25 = vld [vmem:[%s1637_s0 + $0x70] sm:$0xff]  ;;  %v176_v28 = vld [vmem:[%s1639_s4 + $0x20] sm:$0xff]  ;;  %v177_v29 = vld [vmem:[%s1639_s4 + $0x28] sm:$0xff] }
  0x14   :  { %192 = vmatpush.bf16.msra.mxu1 %v1059_v14  ;;  %929 = vmatpush.bf16.msra.mxu3 %v1059_v14  ;;  %v247_v30 = vpack.c.bf16 %v177_v29, %v176_v28  ;;  %v173_v31 = vld [vmem:[%s1639_s4 + $0x8] sm:$0xff]  ;;  %v934_v28 = vld [vmem:[%s1641_s5] ss:$0 sm:$0xff] }
  0x16   :  { %920 = vmatpush.bf16.msra.mxu2 %v115_v40  ;;  %126 = vmatpush.bf16.msra.mxu0 %v115_v40 }
  0x18   :  { %193 = vmatpush.bf16.msra.mxu1 %v1069_v17  ;;  %930 = vmatpush.bf16.msra.mxu3 %v1069_v17 }
  0x1a   :  { %921 = vmatpush.bf16.msra.mxu2 %v114_v44  ;;  %127 = vmatpush.bf16.msra.mxu0 %v114_v44 }
  0x1c   :  { %194 = vmatpush.bf16.msra.mxu1 %v1079_v20  ;;  %931 = vmatpush.bf16.msra.mxu3 %v1079_v20 }
  0x1e   :  { %922 = vmatpush.bf16.msra.mxu2 %v113_v50  ;;  %128 = vmatpush.bf16.msra.mxu0 %v113_v50 }
  0x20   :  { %195 = vmatpush.bf16.msra.mxu1 %v1089_v23  ;;  %932 = vmatpush.bf16.msra.mxu3 %v1089_v23 }
  0x22   :  { %923 = vmatpush.bf16.msra.mxu2 %v112_v53  ;;  %129 = vmatpush.bf16.msra.mxu0 %v112_v53 }
  0x23   :  { %196 = vmatmul.bf16.vlgmr.msra.gmra.mxu1 %v1098_v26  ;;  %216 = vmatmul.bf16.vlgmr.msra.gmra.mxu3 %v1148_v47 }
  0x26   :  { %924 = vmatpush.bf16.msra.mxu2 %v111_v58  ;;  %130 = vmatpush.bf16.msra.mxu0 %v111_v58 }
  0x29   :  { %151 = vmatmul.bf16.vlgmr.msra.gmra.mxu2 %v1049_v11  ;;  %131 = vmatmul.bf16.vlgmr.msra.gmra.mxu0 %v1089_v23  ;;  %v60_v11 = vld [vmem:[%s1637_s0 + $0x68] sm:$0xff]  ;;  %v179_v23 = vld [vmem:[%s1639_s4 + $0x38] sm:$0xff] }
  0x2a   :  { %257 = vmatpush.bf16.msrb.mxu2 %v252_v2  ;;  %v1215_v13 = vpack.c.bf16 %v60_v11, %v59_v10  ;;  %v248_v24 = vpack.c.bf16 %v179_v23, %v178_v22 }
  0x2e   :  { %258 = vmatpush.bf16.msrb.mxu2 %v251_v6 }
  0x32   :  { %259 = vmatpush.bf16.msrb.mxu2 %v250_v19 }
  0x33   :  { %201 = vmatmul.bf16.gmra.mxu1 %v1133_v41  ;;  %221 = vmatmul.bf16.gmra.mxu3 %v1183_v62 }
  0x39   :  { %156 = vmatmul.bf16.gmra.mxu2 %v1039_v8  ;;  %136 = vmatmul.bf16.gmra.mxu0 %v1079_v20  ;;  %v249_v8 = vpack.c.bf16 %v181_v21, %v180_v18  ;;  %v62_v20 = vld [vmem:[%s1637_s0 + $0x78] sm:$0xff] }
  0x3a   :  { %v1245_v27 = vpack.c.bf16 %v62_v20, %v61_v25 }
  0x3b   :  { %260 = vmatpush.bf16.msrb.mxu2 %v249_v8 }
  0x3f   :  { %261 = vmatpush.bf16.msrb.mxu2 %v248_v24 }
  0x43   :  { %206 = vmatmul.bf16.gmra.mxu1 %v1181_v61  ;;  %226 = vmatmul.bf16.gmra.mxu3 %v1215_v13 }
  0x44   :  { %262 = vmatpush.bf16.msrb.mxu2 %v247_v30 }
  0x49   :  { %161 = vmatmul.bf16.gmra.mxu2 %v1029_v5  ;;  %141 = vmatmul.bf16.gmra.mxu0 %v1069_v17  ;;  %v174_v5 = vld [vmem:[%s1639_s4 + $0x10] sm:$0xff] }
  0x53   :  { %211 = vmatmul.bf16.gmra.mxu1 %v1213_v12  ;;  %231 = vmatmul.bf16.gmra.mxu3 %v1245_v27 }
  0x59   :  { %166 = vmatmul.bf16.gmra.mxu2 %v1023_v3  ;;  %146 = vmatmul.bf16.gmra.mxu0 %v1059_v14  ;;  %v175_v3 = vld [vmem:[%s1639_s4 + $0x18] sm:$0xff]  ;;  %v172_v14 = vld [vmem:[%s1639_s4] sm:$0xff] }
  0x5a   :  { %v246_v17 = vpack.c.bf16 %v175_v3, %v174_v5  ;;  %v245_v32 = vpack.c.bf16 %v173_v31, %v172_v14 }
  0x5c   :  { %263 = vmatpush.bf16.msrb.mxu2 %v246_v17 }
  0x60   :  { %264 = vmatpush.bf16.msrb.mxu2 %v245_v32 }
  0xa0   :  { %v197_v33 = vpop.f32.mrf.mxu1 }
  0xa6   :  { %v217_v44 = vpop.f32.mrf.mxu3 }
  0xa8   :  { %v199_v34 = vpop.f32.mrf.mxu1 }
  0xa9   :  { %v237_v35 = vpack.c.bf16 %v199_v34, %v197_v33 }
  0xab   :  { %265 = vmatmul.bf16.vlgmr.msrb.gmra.mxu2 %v237_v35 }
  0xac   :  { %v1270_v49 = vpop.f32.mrf.mxu2 }
  0xae   :  { %v219_v48 = vpop.f32.mrf.mxu3 }
  0xaf   :  { %v241_v51 = vpack.c.bf16 %v219_v48, %v217_v44 }
  0xb0   :  { %v202_v36 = vpop.f32.mrf.mxu1 }
  0xb4   :  { %v1272_v52 = vpop.f32.mrf.mxu2 }
  0xb6   :  { %v222_v50 = vpop.f32.mrf.mxu3 }
  0xb8   :  { %v204_v37 = vpop.f32.mrf.mxu1 }
  0xb9   :  { %v238_v38 = vpack.c.bf16 %v204_v37, %v202_v36 }
  0xbb   :  { %270 = vmatmul.bf16.gmra.mxu2 %v238_v38 }
  0xbc   :  { %v1274_v54 = vpop.f32.mrf.mxu2 }
  0xbe   :  { %v224_v53 = vpop.f32.mrf.mxu3 }
  0xbf   :  { %v242_v56 = vpack.c.bf16 %v224_v53, %v222_v50 }
  0xc0   :  { %v207_v39 = vpop.f32.mrf.mxu1 }
  0xc4   :  { %v1276_v57 = vpop.f32.mrf.mxu2 }
  0xc6   :  { %v227_v55 = vpop.f32.mrf.mxu3 }
  0xc8   :  { %v209_v40 = vpop.f32.mrf.mxu1 }
  0xc9   :  { %v239_v42 = vpack.c.bf16 %v209_v40, %v207_v39 }
  0xcb   :  { %275 = vmatmul.bf16.gmra.mxu2 %v239_v42 }
  0xcc   :  { %v1278_v59 = vpop.f32.mrf.mxu2 }
  0xce   :  { %v229_v58 = vpop.f32.mrf.mxu3 }
  0xcf   :  { %v243_v60 = vpack.c.bf16 %v229_v58, %v227_v55 }
  0xd0   :  { %v212_v43 = vpop.f32.mrf.mxu1 }
  0xd4   :  { %v1280_v0 = vpop.f32.mrf.mxu2 }
  0xd6   :  { %v232_v63 = vpop.f32.mrf.mxu3 }
  0xd8   :  { %v214_v45 = vpop.f32.mrf.mxu1 }
  0xd9   :  { %v240_v46 = vpack.c.bf16 %v214_v45, %v212_v43 }
  0xdb   :  { %280 = vmatmul.bf16.gmra.mxu2 %v240_v46 }
  0xdc   :  { %v1282_v4 = vpop.f32.mrf.mxu2 }
  0xde   :  { %v234_v1 = vpop.f32.mrf.mxu3 }
  0xdf   :  { %v244_v2 = vpack.c.bf16 %v234_v1, %v232_v63 }
  0xe4   :  { %v1284_v6 = vpop.f32.mrf.mxu2 }
  0xeb   :  { %285 = vmatmul.bf16.gmra.mxu2 %v241_v51 }
  0xfb   :  { %290 = vmatmul.bf16.gmra.mxu2 %v242_v56 }
 0x10b   :  { %295 = vmatmul.bf16.gmra.mxu2 %v243_v60 }
 0x11b   :  { %300 = vmatmul.bf16.gmra.mxu2 %v244_v2 }
 0x12e   :  { %v266_v7 = vpop.f32.mrf.mxu2 }
 0x136   :  { %v268_v9 = vpop.f32.mrf.mxu2 }
 0x13e   :  { %v271_v10 = vpop.f32.mrf.mxu2 }
 0x13f   :  { %v272_v1 = vadd.f32 %v934_v28, %v271_v10 }
 0x146   :  { %v273_v11 = vpop.f32.mrf.mxu2 }
 0x147   :  { %v274_v58 = vadd.f32 %v934_v28, %v273_v11  ;;  %v334_v11 = vld [vmem:[%s1642_s6 + $0x60] sm:$0xff] }
 0x14e   :  { %v276_v15 = vpop.f32.mrf.mxu2 }
 0x14f   :  { %v277_v55 = vadd.f32 %v934_v28, %v276_v15  ;;  %v335_v15 = vld [vmem:[%s1642_s6 + $0x68] sm:$0xff] }
 0x151   :  { %v310_v2 = vmax.f32 %v277_v55, 0.0 }
 0x156   :  { %v278_v16 = vpop.f32.mrf.mxu2 }
 0x157   :  { %v279_v50 = vadd.f32 %v934_v28, %v278_v16 }
 0x159   :  { %v311_v60 = vmax.f32 %v279_v50, 0.0 }
 0x15e   :  { %v281_v18 = vpop.f32.mrf.mxu2 }
 0x15f   :  { %v282_v46 = vadd.f32 %v934_v28, %v281_v18 }
 0x161   :  { %v312_v56 = vmax.f32 %v282_v46, 0.0 }
 0x166   :  { %v283_v19 = vpop.f32.mrf.mxu2 }
 0x167   :  { %v284_v43 = vadd.f32 %v934_v28, %v283_v19  ;;  %v340_v19 = vpack.c.bf16 %v311_v60, %v310_v2 }
 0x169   :  { %v313_v51 = vmax.f32 %v284_v43, 0.0 }
 0x16b   :  { %v341_v63 = vpack.c.bf16 %v313_v51, %v312_v56 }
 0x16e   :  { %v286_v21 = vpop.f32.mrf.mxu2 }
 0x16f   :  { %v287_v40 = vadd.f32 %v934_v28, %v286_v21  ;;  %v269_v21 = vadd.f32 %v934_v28, %v268_v9  ;;  %v337_v9 = vld [vmem:[%s1642_s6 + $0x78] sm:$0xff] }
 0x171   :  { %v314_v48 = vmax.f32 %v287_v40, 0.0  ;;  %v307_v18 = vmax.f32 %v269_v21, 0.0  ;;  %v323_v40 = vld [vmem:[%s1642_s6 + $0x8] sm:$0xff] }
 0x176   :  { %v288_v8 = vpop.f32.mrf.mxu2 }
 0x177   :  { %v289_v37 = vadd.f32 %v934_v28, %v288_v8  ;;  %v309_v8 = vmax.f32 %v274_v58, 0.0 }
 0x179   :  { %v315_v44 = vmax.f32 %v289_v37, 0.0  ;;  %v325_v37 = vld [vmem:[%s1642_s6 + $0x18] sm:$0xff] }
 0x17b   :  { %v342_v53 = vpack.c.bf16 %v315_v44, %v314_v48 }
 0x17e   :  { %v291_v22 = vpop.f32.mrf.mxu2 }
 0x17f   :  { %v292_v35 = vadd.f32 %v934_v28, %v291_v22  ;;  %v267_v22 = vadd.f32 %v934_v28, %v266_v7  ;;  %v336_v7 = vld [vmem:[%s1642_s6 + $0x70] sm:$0xff] }
 0x180   :  { %v410_v10 = vpack.c.bf16 %v337_v9, %v336_v7  ;;  %v492_v9 = vld [vmem:[%s1644_s8 + $0x60] sm:$0xff] }
 0x181   :  { %v316_v42 = vmax.f32 %v292_v35, 0.0  ;;  %v306_v16 = vmax.f32 %v267_v22, 0.0 }
 0x182   :  { %415 = vmatpush.bf16.msrb.mxu0 %v410_v10  ;;  %v493_v10 = vld [vmem:[%s1644_s8 + $0x68] sm:$0xff] }
 0x186   :  { %v293_v23 = vpop.f32.mrf.mxu2 }
 0x187   :  { %v294_v32 = vadd.f32 %v934_v28, %v293_v23  ;;  %v308_v23 = vmax.f32 %v272_v1, 0.0 }
 0x189   :  { %v317_v38 = vmax.f32 %v294_v32, 0.0 }
 0x18b   :  { %v343_v45 = vpack.c.bf16 %v317_v38, %v316_v42 }
 0x18e   :  { %v296_v24 = vpop.f32.mrf.mxu2 }
 0x18f   :  { %v297_v17 = vadd.f32 %v934_v28, %v296_v24  ;;  %v339_v24 = vpack.c.bf16 %v309_v8, %v308_v23  ;;  %v494_v23 = vld [vmem:[%s1644_s8 + $0x70] sm:$0xff] }
 0x191   :  { %v318_v36 = vmax.f32 %v297_v17, 0.0 }
 0x196   :  { %v298_v25 = vpop.f32.mrf.mxu2 }
 0x197   :  { %v299_v5 = vadd.f32 %v934_v28, %v298_v25  ;;  %v338_v25 = vpack.c.bf16 %v307_v18, %v306_v16  ;;  %v495_v18 = vld [vmem:[%s1644_s8 + $0x78] sm:$0xff] }
 0x199   :  { %v319_v33 = vmax.f32 %v299_v5, 0.0  ;;  %v330_v5 = vld [vmem:[%s1642_s6 + $0x40] sm:$0xff] }
 0x19b   :  { %v344_v39 = vpack.c.bf16 %v319_v33, %v318_v36  ;;  %v326_v33 = vld [vmem:[%s1642_s6 + $0x20] sm:$0xff]  ;;  %v324_v36 = vld [vmem:[%s1642_s6 + $0x10] sm:$0xff] }
 0x19c   :  { %v404_v38 = vpack.c.bf16 %v325_v37, %v324_v36  ;;  %v485_v36 = vld [vmem:[%s1644_s8 + $0x28] sm:$0xff] }
 0x19e   :  { %v301_v20 = vpop.f32.mrf.mxu2 }
 0x19f   :  { %v302_v29 = vadd.f32 %v934_v28, %v301_v20  ;;  %v332_v20 = vld [vmem:[%s1642_s6 + $0x50] sm:$0xff] }
 0x1a1   :  { %v320_v14 = vmax.f32 %v302_v29, 0.0  ;;  %v333_v29 = vld [vmem:[%s1642_s6 + $0x58] sm:$0xff] }
 0x1a6   :  { %v303_v30 = vpop.f32.mrf.mxu2 }
 0x1a7   :  { %v304_v3 = vadd.f32 %v934_v28, %v303_v30  ;;  %v409_v28 = vpack.c.bf16 %v335_v15, %v334_v11  ;;  %v408_v30 = vpack.c.bf16 %v333_v29, %v332_v20  ;;  %v510_v11 = vpack.c.bf16 %v493_v10, %v492_v9  ;;  %v490_v15 = vld [vmem:[%s1644_s8 + $0x50] sm:$0xff]  ;;  %v491_v20 = vld [vmem:[%s1644_s8 + $0x58] sm:$0xff]  ;;  %v488_v29 = vld [vmem:[%s1644_s8 + $0x40] sm:$0xff] }
 0x1a9   :  { %v321_v31 = vmax.f32 %v304_v3, 0.0  ;;  %416 = vmatpush.bf16.msrb.mxu0 %v409_v28  ;;  %v331_v3 = vld [vmem:[%s1642_s6 + $0x48] sm:$0xff]  ;;  %v509_v28 = vpack.c.bf16 %v491_v20, %v490_v15 }
 0x1aa   :  { %v407_v17 = vpack.c.bf16 %v331_v3, %v330_v5 }
 0x1ab   :  { %v345_v34 = vpack.c.bf16 %v321_v31, %v320_v14  ;;  %v328_v14 = vld [vmem:[%s1642_s6 + $0x30] sm:$0xff]  ;;  %v329_v31 = vld [vmem:[%s1642_s6 + $0x38] sm:$0xff] }
 0x1ac   :  { %v406_v32 = vpack.c.bf16 %v329_v31, %v328_v14  ;;  %v486_v14 = vld [vmem:[%s1644_s8 + $0x30] sm:$0xff]  ;;  %v487_v31 = vld [vmem:[%s1644_s8 + $0x38] sm:$0xff] }
 0x1ad   :  { %346 = vmatpush.bf16.msrb.mxu3 %v345_v34  ;;  %417 = vmatpush.bf16.msrb.mxu0 %v408_v30  ;;  %v327_v34 = vld [vmem:[%s1642_s6 + $0x28] sm:$0xff] }
 0x1ae   :  { %v405_v35 = vpack.c.bf16 %v327_v34, %v326_v33  ;;  %v489_v30 = vld [vmem:[%s1644_s8 + $0x48] sm:$0xff] }
 0x1af   :  { %v508_v3 = vpack.c.bf16 %v489_v30, %v488_v29 }
 0x1b1   :  { %347 = vmatpush.bf16.msrb.mxu3 %v344_v39  ;;  %418 = vmatpush.bf16.msrb.mxu0 %v407_v17  ;;  %v322_v39 = vld [vmem:[%s1642_s6] sm:$0xff] }
 0x1b2   :  { %v403_v42 = vpack.c.bf16 %v323_v40, %v322_v39  ;;  %v482_v39 = vld [vmem:[%s1644_s8 + $0x10] sm:$0xff]  ;;  %v483_v40 = vld [vmem:[%s1644_s8 + $0x18] sm:$0xff] }
 0x1b5   :  { %348 = vmatpush.bf16.msrb.mxu3 %v343_v45  ;;  %419 = vmatpush.bf16.msrb.mxu0 %v406_v32  ;;  %v507_v32 = vpack.c.bf16 %v487_v31, %v486_v14 }
 0x1b9   :  { %349 = vmatpush.bf16.msrb.mxu3 %v342_v53  ;;  %420 = vmatpush.bf16.msrb.mxu0 %v405_v35  ;;  %v484_v35 = vld [vmem:[%s1644_s8 + $0x20] sm:$0xff] }
 0x1ba   :  { %v506_v37 = vpack.c.bf16 %v485_v36, %v484_v35 }
 0x1bd   :  { %350 = vmatpush.bf16.msrb.mxu3 %v341_v63  ;;  %421 = vmatpush.bf16.msrb.mxu0 %v404_v38  ;;  %v1345_v63 = vpop.f32.mrf.mxu0 }
 0x1c1   :  { %351 = vmatpush.bf16.msrb.mxu3 %v340_v19  ;;  %422 = vmatpush.bf16.msrb.mxu0 %v403_v42  ;;  %v505_v42 = vpack.c.bf16 %v483_v40, %v482_v39 }
 0x1c5   :  { %352 = vmatpush.bf16.msrb.mxu3 %v339_v24  ;;  %v1347_v2 = vpop.f32.mrf.mxu0  ;;  %v511_v24 = vpack.c.bf16 %v495_v18, %v494_v23 }
 0x1c7   :  { %512 = vmatpush.bf16.msrb.mxu1 %v511_v24 }
 0x1c9   :  { %353 = vmatpush.bf16.msrb.mxu3 %v338_v25 }
 0x1cb   :  { %513 = vmatpush.bf16.msrb.mxu1 %v510_v11 }
 0x1cc   :  { %354 = vmatmul.bf16.vlgmr.msrb.gmra.mxu3 %v1098_v26 }
 0x1cd   :  { %v1349_v19 = vpop.f32.mrf.mxu0 }
 0x1cf   :  { %514 = vmatpush.bf16.msrb.mxu1 %v509_v28 }
 0x1d3   :  { %515 = vmatpush.bf16.msrb.mxu1 %v508_v3 }
 0x1d5   :  { %v1357_v16 = vpop.f32.mrf.mxu0 }
 0x1d7   :  { %516 = vmatpush.bf16.msrb.mxu1 %v507_v32 }
 0x1db   :  { %517 = vmatpush.bf16.msrb.mxu1 %v506_v37 }
 0x1dc   :  { %359 = vmatmul.bf16.gmra.mxu3 %v1133_v41 }
 0x1dd   :  { %v1377_v17 = vpop.f32.mrf.mxu0 }
 0x1df   :  { %518 = vmatpush.bf16.msrb.mxu1 %v505_v42 }
 0x1e5   :  { %v1391_v38 = vpop.f32.mrf.mxu0 }
 0x1ec   :  { %364 = vmatmul.bf16.gmra.mxu3 %v1181_v61 }
 0x1fc   :  { %369 = vmatmul.bf16.gmra.mxu3 %v1213_v12 }
 0x20c   :  { %374 = vmatmul.bf16.gmra.mxu3 %v1148_v47 }
 0x21c   :  { %379 = vmatmul.bf16.gmra.mxu3 %v1183_v62 }
 0x22c   :  { %384 = vmatmul.bf16.gmra.mxu3 %v1215_v13 }
 0x23c   :  { %389 = vmatmul.bf16.gmra.mxu3 %v1245_v27 }
 0x24f   :  { %v355_v43 = vpop.f32.mrf.mxu3 }
 0x257   :  { %v357_v44 = vpop.f32.mrf.mxu3 }
 0x258   :  { %v395_v45 = vpack.c.bf16 %v357_v44, %v355_v43  ;;  %v480_v44 = vld [vmem:[%s1644_s8] sm:$0xff] }
 0x25a   :  { %423 = vmatmul.bf16.vlgmr.msrb.gmra.mxu0 %v395_v45  ;;  %v481_v45 = vld [vmem:[%s1644_s8 + $0x8] sm:$0xff] }
 0x25f   :  { %v360_v46 = vpop.f32.mrf.mxu3 }
 0x267   :  { %v362_v48 = vpop.f32.mrf.mxu3 }
 0x268   :  { %v396_v50 = vpack.c.bf16 %v362_v48, %v360_v46  ;;  %v504_v46 = vpack.c.bf16 %v481_v45, %v480_v44  ;;  %v1405_v48 = vpop.f32.mrf.mxu0 }
 0x26a   :  { %428 = vmatmul.bf16.gmra.mxu0 %v396_v50  ;;  %519 = vmatpush.bf16.msrb.mxu1 %v504_v46 }
 0x26f   :  { %v365_v51 = vpop.f32.mrf.mxu3 }
 0x277   :  { %v367_v53 = vpop.f32.mrf.mxu3 }
 0x278   :  { %v397_v55 = vpack.c.bf16 %v367_v53, %v365_v51  ;;  %v1407_v53 = vpop.f32.mrf.mxu0 }
 0x27a   :  { %433 = vmatmul.bf16.gmra.mxu0 %v397_v55 }
 0x27f   :  { %v370_v56 = vpop.f32.mrf.mxu3 }
 0x287   :  { %v372_v58 = vpop.f32.mrf.mxu3 }
 0x288   :  { %v398_v60 = vpack.c.bf16 %v372_v58, %v370_v56  ;;  %v935_v56 = vld [vmem:[%s1643_s7] ss:$0 sm:$0xff] }
 0x28a   :  { %438 = vmatmul.bf16.gmra.mxu0 %v398_v60 }
 0x28f   :  { %v375_v1 = vpop.f32.mrf.mxu3 }
 0x297   :  { %v377_v21 = vpop.f32.mrf.mxu3 }
 0x298   :  { %v399_v8 = vpack.c.bf16 %v377_v21, %v375_v1 }
 0x29a   :  { %443 = vmatmul.bf16.gmra.mxu0 %v399_v8 }
 0x29f   :  { %v380_v22 = vpop.f32.mrf.mxu3 }
 0x2a7   :  { %v382_v25 = vpop.f32.mrf.mxu3 }
 0x2a8   :  { %v400_v7 = vpack.c.bf16 %v382_v25, %v380_v22 }
 0x2aa   :  { %448 = vmatmul.bf16.gmra.mxu0 %v400_v7 }
 0x2af   :  { %v385_v5 = vpop.f32.mrf.mxu3 }
 0x2b7   :  { %v387_v33 = vpop.f32.mrf.mxu3 }
 0x2b8   :  { %v401_v34 = vpack.c.bf16 %v387_v33, %v385_v5 }
 0x2ba   :  { %453 = vmatmul.bf16.gmra.mxu0 %v401_v34 }
 0x2bf   :  { %v390_v43 = vpop.f32.mrf.mxu3 }
 0x2c7   :  { %v392_v50 = vpop.f32.mrf.mxu3 }
 0x2c8   :  { %v402_v51 = vpack.c.bf16 %v392_v50, %v390_v43 }
 0x2ca   :  { %458 = vmatmul.bf16.gmra.mxu0 %v402_v51 }
 0x2d7   :  { %v424_v55 = vpop.f32.mrf.mxu0 }
 0x2d8   :  { %v425_v58 = vadd.f32 %v935_v56, %v424_v55 }
 0x2da   :  { %v464_v21 = vmax.f32 %v425_v58, 0.0 }
 0x2df   :  { %v426_v60 = vpop.f32.mrf.mxu0 }
 0x2e0   :  { %v427_v1 = vadd.f32 %v935_v56, %v426_v60 }
 0x2e2   :  { %v465_v8 = vmax.f32 %v427_v1, 0.0 }
 0x2e4   :  { %v496_v22 = vpack.c.bf16 %v465_v8, %v464_v21 }
 0x2e6   :  { %520 = vmatmul.bf16.vlgmr.msrb.gmra.mxu1 %v496_v22 }
 0x2e7   :  { %v429_v23 = vpop.f32.mrf.mxu0 }
 0x2e8   :  { %v430_v18 = vadd.f32 %v935_v56, %v429_v23 }
 0x2ea   :  { %v466_v7 = vmax.f32 %v430_v18, 0.0 }
 0x2ef   :  { %v431_v24 = vpop.f32.mrf.mxu0 }
 0x2f0   :  { %v432_v25 = vadd.f32 %v935_v56, %v431_v24 }
 0x2f2   :  { %v467_v9 = vmax.f32 %v432_v25, 0.0 }
 0x2f4   :  { %v497_v10 = vpack.c.bf16 %v467_v9, %v466_v7 }
 0x2f6   :  { %525 = vmatmul.bf16.gmra.mxu1 %v497_v10 }
 0x2f7   :  { %v434_v11 = vpop.f32.mrf.mxu0 }
 0x2f8   :  { %v435_v15 = vadd.f32 %v935_v56, %v434_v11 }
 0x2fa   :  { %v468_v29 = vmax.f32 %v435_v15, 0.0 }
 0x2ff   :  { %v436_v20 = vpop.f32.mrf.mxu0 }
 0x300   :  { %v437_v28 = vadd.f32 %v935_v56, %v436_v20 }
 0x302   :  { %v469_v30 = vmax.f32 %v437_v28, 0.0 }
 0x304   :  { %v498_v5 = vpack.c.bf16 %v469_v30, %v468_v29 }
 0x306   :  { %530 = vmatmul.bf16.gmra.mxu1 %v498_v5 }
 0x307   :  { %v439_v3 = vpop.f32.mrf.mxu0 }
 0x308   :  { %v440_v14 = vadd.f32 %v935_v56, %v439_v3 }
 0x30a   :  { %v470_v33 = vmax.f32 %v440_v14, 0.0 }
 0x30f   :  { %v441_v31 = vpop.f32.mrf.mxu0 }
 0x310   :  { %v442_v32 = vadd.f32 %v935_v56, %v441_v31 }
 0x312   :  { %v471_v34 = vmax.f32 %v442_v32, 0.0 }
 0x314   :  { %v499_v35 = vpack.c.bf16 %v471_v34, %v470_v33 }
 0x316   :  { %535 = vmatmul.bf16.gmra.mxu1 %v499_v35 }
 0x317   :  { %v444_v36 = vpop.f32.mrf.mxu0 }
 0x318   :  { %v445_v37 = vadd.f32 %v935_v56, %v444_v36 }
 0x31a   :  { %v472_v42 = vmax.f32 %v445_v37, 0.0 }
 0x31f   :  { %v446_v39 = vpop.f32.mrf.mxu0 }
 0x320   :  { %v447_v40 = vadd.f32 %v935_v56, %v446_v39 }
 0x322   :  { %v473_v43 = vmax.f32 %v447_v40, 0.0 }
 0x324   :  { %v500_v44 = vpack.c.bf16 %v473_v43, %v472_v42 }
 0x326   :  { %540 = vmatmul.bf16.gmra.mxu1 %v500_v44 }
 0x327   :  { %v449_v45 = vpop.f32.mrf.mxu0 }
 0x328   :  { %v450_v46 = vadd.f32 %v935_v56, %v449_v45 }
 0x32a   :  { %v474_v55 = vmax.f32 %v450_v46, 0.0 }
 0x32f   :  { %v451_v50 = vpop.f32.mrf.mxu0 }
 0x330   :  { %v452_v51 = vadd.f32 %v935_v56, %v451_v50 }
 0x332   :  { %v475_v58 = vmax.f32 %v452_v51, 0.0 }
 0x334   :  { %v501_v60 = vpack.c.bf16 %v475_v58, %v474_v55  ;;  %v652_v58 = vld [vmem:[%s1646_s10 + $0x70] sm:$0xff] }
 0x336   :  { %545 = vmatmul.bf16.gmra.mxu1 %v501_v60  ;;  %v653_v60 = vld [vmem:[%s1646_s10 + $0x78] sm:$0xff] }
 0x337   :  { %v454_v1 = vpop.f32.mrf.mxu0 }
 0x338   :  { %v455_v21 = vadd.f32 %v935_v56, %v454_v1  ;;  %v650_v1 = vld [vmem:[%s1646_s10 + $0x60] sm:$0xff] }
 0x33a   :  { %v476_v23 = vmax.f32 %v455_v21, 0.0  ;;  %v669_v21 = vpack.c.bf16 %v653_v60, %v652_v58 }
 0x33c   :  { %670 = vmatpush.bf16.msra.mxu3 %v669_v21 }
 0x33f   :  { %v456_v8 = vpop.f32.mrf.mxu0 }
 0x340   :  { %v457_v22 = vadd.f32 %v935_v56, %v456_v8  ;;  %v651_v8 = vld [vmem:[%s1646_s10 + $0x68] sm:$0xff] }
 0x342   :  { %v477_v18 = vmax.f32 %v457_v22, 0.0  ;;  %v668_v22 = vpack.c.bf16 %v651_v8, %v650_v1 }
 0x344   :  { %v502_v24 = vpack.c.bf16 %v477_v18, %v476_v23  ;;  %v648_v23 = vld [vmem:[%s1646_s10 + $0x50] sm:$0xff]  ;;  %v649_v18 = vld [vmem:[%s1646_s10 + $0x58] sm:$0xff]  ;;  %671 = vmatpush.bf16.msra.mxu3 %v668_v22 }
 0x346   :  { %550 = vmatmul.bf16.gmra.mxu1 %v502_v24  ;;  %v667_v24 = vpack.c.bf16 %v649_v18, %v648_v23 }
 0x347   :  { %v459_v25 = vpop.f32.mrf.mxu0 }
 0x348   :  { %v460_v7 = vadd.f32 %v935_v56, %v459_v25  ;;  %v646_v25 = vld [vmem:[%s1646_s10 + $0x40] sm:$0xff]  ;;  %672 = vmatpush.bf16.msra.mxu3 %v667_v24 }
 0x34a   :  { %v478_v11 = vmax.f32 %v460_v7, 0.0  ;;  %v647_v7 = vld [vmem:[%s1646_s10 + $0x48] sm:$0xff] }
 0x34f   :  { %v461_v9 = vpop.f32.mrf.mxu0 }
 0x350   :  { %v462_v10 = vadd.f32 %v935_v56, %v461_v9  ;;  %v666_v9 = vpack.c.bf16 %v647_v7, %v646_v25 }
 0x352   :  { %v479_v15 = vmax.f32 %v462_v10, 0.0  ;;  %673 = vmatpush.bf16.msra.mxu3 %v666_v9  ;;  %v644_v10 = vld [vmem:[%s1646_s10 + $0x30] sm:$0xff] }
 0x354   :  { %v503_v20 = vpack.c.bf16 %v479_v15, %v478_v11  ;;  %v645_v11 = vld [vmem:[%s1646_s10 + $0x38] sm:$0xff] }
 0x355   :  { %v665_v15 = vpack.c.bf16 %v645_v11, %v644_v10 }
 0x356   :  { %555 = vmatmul.bf16.gmra.mxu1 %v503_v20  ;;  %v642_v20 = vld [vmem:[%s1646_s10 + $0x20] sm:$0xff] }
 0x357   :  { %674 = vmatpush.bf16.msra.mxu3 %v665_v15 }
 0x363   :  { %v521_v28 = vpop.f32.mrf.mxu1 }
 0x36b   :  { %v523_v29 = vpop.f32.mrf.mxu1 }
 0x36c   :  { %v561_v55 = vpack.c.bf16 %v523_v29, %v521_v28  ;;  %v643_v28 = vld [vmem:[%s1646_s10 + $0x28] sm:$0xff] }
 0x36d   :  { %v664_v29 = vpack.c.bf16 %v643_v28, %v642_v20 }
 0x36f   :  { %675 = vmatpush.bf16.msra.mxu3 %v664_v29 }
 0x373   :  { %v526_v30 = vpop.f32.mrf.mxu1 }
 0x37b   :  { %v528_v5 = vpop.f32.mrf.mxu1 }
 0x37c   :  { %v562_v51 = vpack.c.bf16 %v528_v5, %v526_v30  ;;  %v640_v30 = vld [vmem:[%s1646_s10 + $0x10] sm:$0xff]  ;;  %v641_v5 = vld [vmem:[%s1646_s10 + $0x18] sm:$0xff] }
 0x383   :  { %v531_v3 = vpop.f32.mrf.mxu1 }
 0x38b   :  { %v533_v14 = vpop.f32.mrf.mxu1 }
 0x38c   :  { %v563_v50 = vpack.c.bf16 %v533_v14, %v531_v3  ;;  %v663_v3 = vpack.c.bf16 %v641_v5, %v640_v30  ;;  %v638_v14 = vld [vmem:[%s1646_s10] sm:$0xff] }
 0x38e   :  { %676 = vmatpush.bf16.msra.mxu3 %v663_v3 }
 0x393   :  { %v536_v31 = vpop.f32.mrf.mxu1 }
 0x39b   :  { %v538_v32 = vpop.f32.mrf.mxu1 }
 0x39c   :  { %v564_v46 = vpack.c.bf16 %v538_v32, %v536_v31  ;;  %v639_v31 = vld [vmem:[%s1646_s10 + $0x8] sm:$0xff] }
 0x39d   :  { %v662_v32 = vpack.c.bf16 %v639_v31, %v638_v14 }
 0x39f   :  { %677 = vmatpush.bf16.msra.mxu3 %v662_v32 }
 0x3a3   :  { %v541_v33 = vpop.f32.mrf.mxu1 }
 0x3ab   :  { %v543_v34 = vpop.f32.mrf.mxu1 }
 0x3ac   :  { %v565_v45 = vpack.c.bf16 %v543_v34, %v541_v33  ;;  %v936_v34 = vld [vmem:[%s1645_s9] ss:$0 sm:$0xff] }
 0x3b3   :  { %v546_v35 = vpop.f32.mrf.mxu1 }
 0x3bb   :  { %v548_v36 = vpop.f32.mrf.mxu1 }
 0x3bc   :  { %v566_v44 = vpack.c.bf16 %v548_v36, %v546_v35 }
 0x3c3   :  { %v551_v37 = vpop.f32.mrf.mxu1 }
 0x3cb   :  { %v553_v39 = vpop.f32.mrf.mxu1 }
 0x3cc   :  { %v567_v43 = vpack.c.bf16 %v553_v39, %v551_v37 }
 0x3d3   :  { %v556_v40 = vpop.f32.mrf.mxu1 }
 0x3db   :  { %v558_v56 = vpop.f32.mrf.mxu1 }
 0x3dc   :  { %v568_v42 = vpack.c.bf16 %v558_v56, %v556_v40 }
 0x3de   :  { %573 = vmatpush.bf16.msra.mxu2 %v568_v42 }
 0x3e2   :  { %574 = vmatpush.bf16.msra.mxu2 %v567_v43 }
 0x3e6   :  { %575 = vmatpush.bf16.msra.mxu2 %v566_v44 }
 0x3ea   :  { %576 = vmatpush.bf16.msra.mxu2 %v565_v45 }
 0x3ee   :  { %577 = vmatpush.bf16.msra.mxu2 %v564_v46 }
 0x3f2   :  { %578 = vmatpush.bf16.msra.mxu2 %v563_v50 }
 0x3f6   :  { %579 = vmatpush.bf16.msra.mxu2 %v562_v51 }
 0x3fa   :  { %580 = vmatpush.bf16.msra.mxu2 %v561_v55 }
 0x3fd   :  { %581 = vmatmul.bf16.vlgmr.msra.gmra.mxu2 %v1098_v26 }
 0x40d   :  { %586 = vmatmul.bf16.gmra.mxu2 %v1133_v41 }
 0x41d   :  { %591 = vmatmul.bf16.gmra.mxu2 %v1181_v61 }
 0x42d   :  { %596 = vmatmul.bf16.gmra.mxu2 %v1213_v12 }
 0x43d   :  { %601 = vmatmul.bf16.gmra.mxu2 %v1148_v47 }
 0x44d   :  { %606 = vmatmul.bf16.gmra.mxu2 %v1183_v62 }
 0x45d   :  { %611 = vmatmul.bf16.gmra.mxu2 %v1215_v13 }
 0x46d   :  { %616 = vmatmul.bf16.gmra.mxu2 %v1245_v27 }
 0x480   :  { %v582_v33 = vpop.f32.mrf.mxu2 }
 0x481   :  { %v583_v35 = vadd.f32 %v936_v34, %v582_v33 }
 0x483   :  { %v622_v39 = vmax.f32 %v583_v35, 0.0 }
 0x488   :  { %v584_v36 = vpop.f32.mrf.mxu2 }
 0x489   :  { %v585_v37 = vadd.f32 %v936_v34, %v584_v36 }
 0x48b   :  { %v623_v40 = vmax.f32 %v585_v37, 0.0 }
 0x48d   :  { %v654_v56 = vpack.c.bf16 %v623_v40, %v622_v39 }
 0x48f   :  { %678 = vmatmul.bf16.vlgmr.msra.gmra.mxu3 %v654_v56 }
 0x490   :  { %v587_v42 = vpop.f32.mrf.mxu2 }
 0x491   :  { %v588_v43 = vadd.f32 %v936_v34, %v587_v42 }
 0x493   :  { %v624_v46 = vmax.f32 %v588_v43, 0.0 }
 0x498   :  { %v589_v44 = vpop.f32.mrf.mxu2 }
 0x499   :  { %v590_v45 = vadd.f32 %v936_v34, %v589_v44 }
 0x49b   :  { %v625_v50 = vmax.f32 %v590_v45, 0.0 }
 0x49d   :  { %v655_v51 = vpack.c.bf16 %v625_v50, %v624_v46 }
 0x49f   :  { %683 = vmatmul.bf16.gmra.mxu3 %v655_v51 }
 0x4a0   :  { %v592_v55 = vpop.f32.mrf.mxu2 }
 0x4a1   :  { %v593_v58 = vadd.f32 %v936_v34, %v592_v55 }
 0x4a3   :  { %v626_v21 = vmax.f32 %v593_v58, 0.0 }
 0x4a8   :  { %v594_v60 = vpop.f32.mrf.mxu2 }
 0x4a9   :  { %v595_v1 = vadd.f32 %v936_v34, %v594_v60 }
 0x4ab   :  { %v627_v8 = vmax.f32 %v595_v1, 0.0 }
 0x4ad   :  { %v656_v22 = vpack.c.bf16 %v627_v8, %v626_v21 }
 0x4af   :  { %688 = vmatmul.bf16.gmra.mxu3 %v656_v22 }
 0x4b0   :  { %v597_v23 = vpop.f32.mrf.mxu2 }
 0x4b1   :  { %v598_v18 = vadd.f32 %v936_v34, %v597_v23 }
 0x4b3   :  { %v628_v7 = vmax.f32 %v598_v18, 0.0 }
 0x4b8   :  { %v599_v24 = vpop.f32.mrf.mxu2 }
 0x4b9   :  { %v600_v25 = vadd.f32 %v936_v34, %v599_v24 }
 0x4bb   :  { %v629_v9 = vmax.f32 %v600_v25, 0.0 }
 0x4bd   :  { %v657_v10 = vpack.c.bf16 %v629_v9, %v628_v7 }
 0x4bf   :  { %693 = vmatmul.bf16.gmra.mxu3 %v657_v10 }
 0x4c0   :  { %v602_v11 = vpop.f32.mrf.mxu2 }
 0x4c1   :  { %v603_v15 = vadd.f32 %v936_v34, %v602_v11 }
 0x4c3   :  { %v630_v29 = vmax.f32 %v603_v15, 0.0 }
 0x4c8   :  { %v604_v20 = vpop.f32.mrf.mxu2 }
 0x4c9   :  { %v605_v28 = vadd.f32 %v936_v34, %v604_v20 }
 0x4cb   :  { %v631_v30 = vmax.f32 %v605_v28, 0.0 }
 0x4cd   :  { %v658_v5 = vpack.c.bf16 %v631_v30, %v630_v29 }
 0x4cf   :  { %698 = vmatmul.bf16.gmra.mxu3 %v658_v5 }
 0x4d0   :  { %v607_v3 = vpop.f32.mrf.mxu2 }
 0x4d1   :  { %v608_v14 = vadd.f32 %v936_v34, %v607_v3 }
 0x4d3   :  { %v632_v33 = vmax.f32 %v608_v14, 0.0 }
 0x4d8   :  { %v609_v31 = vpop.f32.mrf.mxu2 }
 0x4d9   :  { %v610_v32 = vadd.f32 %v936_v34, %v609_v31 }
 0x4db   :  { %v633_v35 = vmax.f32 %v610_v32, 0.0 }
 0x4dd   :  { %v659_v36 = vpack.c.bf16 %v633_v35, %v632_v33  ;;  %v826_v35 = vld [vmem:[%s1648_s12 + $0x70] sm:$0xff] }
 0x4df   :  { %703 = vmatmul.bf16.gmra.mxu3 %v659_v36  ;;  %v827_v36 = vld [vmem:[%s1648_s12 + $0x78] sm:$0xff] }
 0x4e0   :  { %v612_v37 = vpop.f32.mrf.mxu2 }
 0x4e1   :  { %v613_v39 = vadd.f32 %v936_v34, %v612_v37  ;;  %v843_v37 = vpack.c.bf16 %v827_v36, %v826_v35 }
 0x4e3   :  { %v634_v42 = vmax.f32 %v613_v39, 0.0  ;;  %848 = vmatpush.bf16.msra.mxu1 %v843_v37 }
 0x4e8   :  { %v614_v40 = vpop.f32.mrf.mxu2 }
 0x4e9   :  { %v615_v56 = vadd.f32 %v936_v34, %v614_v40  ;;  %v821_v40 = vld [vmem:[%s1648_s12 + $0x48] sm:$0xff] }
 0x4eb   :  { %v635_v43 = vmax.f32 %v615_v56, 0.0 }
 0x4ed   :  { %v660_v44 = vpack.c.bf16 %v635_v43, %v634_v42  ;;  %v818_v42 = vld [vmem:[%s1648_s12 + $0x30] sm:$0xff]  ;;  %v819_v43 = vld [vmem:[%s1648_s12 + $0x38] sm:$0xff] }
 0x4ef   :  { %708 = vmatmul.bf16.gmra.mxu3 %v660_v44  ;;  %v839_v44 = vpack.c.bf16 %v819_v43, %v818_v42 }
 0x4f0   :  { %v617_v45 = vpop.f32.mrf.mxu2 }
 0x4f1   :  { %v618_v46 = vadd.f32 %v936_v34, %v617_v45  ;;  %v816_v45 = vld [vmem:[%s1648_s12 + $0x20] sm:$0xff] }
 0x4f3   :  { %v636_v55 = vmax.f32 %v618_v46, 0.0  ;;  %v817_v46 = vld [vmem:[%s1648_s12 + $0x28] sm:$0xff] }
 0x4f8   :  { %v619_v50 = vpop.f32.mrf.mxu2 }
 0x4f9   :  { %v620_v51 = vadd.f32 %v936_v34, %v619_v50  ;;  %v838_v50 = vpack.c.bf16 %v817_v46, %v816_v45 }
 0x4fb   :  { %v637_v58 = vmax.f32 %v620_v51, 0.0  ;;  %v814_v51 = vld [vmem:[%s1648_s12 + $0x10] sm:$0xff] }
 0x4fd   :  { %v661_v60 = vpack.c.bf16 %v637_v58, %v636_v55  ;;  %v815_v55 = vld [vmem:[%s1648_s12 + $0x18] sm:$0xff] }
 0x4fe   :  { %v837_v58 = vpack.c.bf16 %v815_v55, %v814_v51 }
 0x4ff   :  { %713 = vmatmul.bf16.gmra.mxu3 %v661_v60  ;;  %v813_v60 = vld [vmem:[%s1648_s12 + $0x8] sm:$0xff] }
 0x512   :  { %v679_v1 = vpop.f32.mrf.mxu3 }
 0x51a   :  { %v681_v21 = vpop.f32.mrf.mxu3 }
 0x51b   :  { %v719_v8 = vpack.c.bf16 %v681_v21, %v679_v1 }
 0x522   :  { %v684_v22 = vpop.f32.mrf.mxu3 }
 0x52a   :  { %v686_v23 = vpop.f32.mrf.mxu3 }
 0x52b   :  { %v720_v18 = vpack.c.bf16 %v686_v23, %v684_v22  ;;  %v1535_v22 = vld [vmem:[%s1640_s3] ss:$0 sm:$0xff] }
 0x52c   :  { %v143_v35 = vadd.f32 %v1535_v22, %v1377_v17  ;;  %v150_v17 = vadd.f32 %v1535_v22, %v1407_v53  ;;  %v153_v51 = vadd.f32 %v1535_v22, %v1270_v49  ;;  %v160_v49 = vadd.f32 %v1535_v22, %v1276_v57 }
 0x532   :  { %v689_v24 = vpop.f32.mrf.mxu3 }
 0x53a   :  { %v691_v25 = vpop.f32.mrf.mxu3 }
 0x53b   :  { %v721_v7 = vpack.c.bf16 %v691_v25, %v689_v24 }
 0x542   :  { %v694_v9 = vpop.f32.mrf.mxu3 }
 0x54a   :  { %v696_v10 = vpop.f32.mrf.mxu3 }
 0x54b   :  { %v722_v11 = vpack.c.bf16 %v696_v10, %v694_v9 }
 0x552   :  { %v699_v15 = vpop.f32.mrf.mxu3 }
 0x55a   :  { %v701_v20 = vpop.f32.mrf.mxu3 }
 0x55b   :  { %v723_v33 = vpack.c.bf16 %v701_v20, %v699_v15 }
 0x562   :  { %v704_v28 = vpop.f32.mrf.mxu3 }
 0x56a   :  { %v706_v34 = vpop.f32.mrf.mxu3 }
 0x56b   :  { %v724_v32 = vpack.c.bf16 %v706_v34, %v704_v28  ;;  %v138_v34 = vadd.f32 %v1535_v22, %v1349_v19  ;;  %v145_v19 = vadd.f32 %v1535_v22, %v1391_v38 }
 0x572   :  { %v709_v29 = vpop.f32.mrf.mxu3 }
 0x57a   :  { %v711_v30 = vpop.f32.mrf.mxu3 }
 0x57b   :  { %v725_v31 = vpack.c.bf16 %v711_v30, %v709_v29 }
 0x582   :  { %v714_v5 = vpop.f32.mrf.mxu3 }
 0x58a   :  { %v716_v3 = vpop.f32.mrf.mxu3 }
 0x58b   :  { %v726_v14 = vpack.c.bf16 %v716_v3, %v714_v5 }
 0x58d   :  { %731 = vmatpush.bf16.msra.mxu0 %v726_v14 }
 0x591   :  { %732 = vmatpush.bf16.msra.mxu0 %v725_v31 }
 0x595   :  { %733 = vmatpush.bf16.msra.mxu0 %v724_v32 }
 0x599   :  { %734 = vmatpush.bf16.msra.mxu0 %v723_v33 }
 0x59d   :  { %735 = vmatpush.bf16.msra.mxu0 %v722_v11 }
 0x5a1   :  { %736 = vmatpush.bf16.msra.mxu0 %v721_v7 }
 0x5a5   :  { %737 = vmatpush.bf16.msra.mxu0 %v720_v18  ;;  %v133_v18 = vadd.f32 %v1535_v22, %v1345_v63  ;;  %v140_v63 = vadd.f32 %v1535_v22, %v1357_v16 }
 0x5a9   :  { %738 = vmatpush.bf16.msra.mxu0 %v719_v8  ;;  %v1530_v8 = vld [vmem:[%s1647_s11] ss:$0 sm:$0xff] }
 0x5ac   :  { %739 = vmatmul.bf16.vlgmr.msra.gmra.mxu0 %v1098_v26  ;;  %v824_v26 = vld [vmem:[%s1648_s12 + $0x60] sm:$0xff] }
 0x5bc   :  { %744 = vmatmul.bf16.gmra.mxu0 %v1133_v41  ;;  %v825_v41 = vld [vmem:[%s1648_s12 + $0x68] sm:$0xff] }
 0x5cc   :  { %749 = vmatmul.bf16.gmra.mxu0 %v1181_v61  ;;  %v842_v61 = vpack.c.bf16 %v825_v41, %v824_v26 }
 0x5ce   :  { %849 = vmatpush.bf16.msra.mxu1 %v842_v61 }
 0x5dc   :  { %754 = vmatmul.bf16.gmra.mxu0 %v1213_v12  ;;  %v823_v12 = vld [vmem:[%s1648_s12 + $0x58] sm:$0xff] }
 0x5ec   :  { %759 = vmatmul.bf16.gmra.mxu0 %v1148_v47  ;;  %v822_v47 = vld [vmem:[%s1648_s12 + $0x50] sm:$0xff] }
 0x5ed   :  { %v841_v39 = vpack.c.bf16 %v823_v12, %v822_v47 }
 0x5ef   :  { %850 = vmatpush.bf16.msra.mxu1 %v841_v39 }
 0x5fc   :  { %764 = vmatmul.bf16.gmra.mxu0 %v1183_v62  ;;  %v820_v62 = vld [vmem:[%s1648_s12 + $0x40] sm:$0xff] }
 0x5fd   :  { %v840_v56 = vpack.c.bf16 %v821_v40, %v820_v62  ;;  %v148_v62 = vadd.f32 %v1535_v22, %v1405_v48  ;;  %v155_v48 = vadd.f32 %v1535_v22, %v1272_v52 }
 0x5ff   :  { %851 = vmatpush.bf16.msra.mxu1 %v840_v56 }
 0x603   :  { %852 = vmatpush.bf16.msra.mxu1 %v839_v44 }
 0x607   :  { %853 = vmatpush.bf16.msra.mxu1 %v838_v50 }
 0x60b   :  { %854 = vmatpush.bf16.msra.mxu1 %v837_v58 }
 0x60c   :  { %769 = vmatmul.bf16.gmra.mxu0 %v1215_v13  ;;  %v812_v13 = vld [vmem:[%s1648_s12] sm:$0xff] }
 0x60d   :  { %v836_v1 = vpack.c.bf16 %v813_v60, %v812_v13 }
 0x60f   :  { %855 = vmatpush.bf16.msra.mxu1 %v836_v1 }
 0x61c   :  { %774 = vmatmul.bf16.gmra.mxu0 %v1245_v27  ;;  %v135_v27 = vadd.f32 %v1535_v22, %v1347_v2 }
 0x629   :  { %v740_v21 = vpop.f32.mrf.mxu0 }
 0x62a   :  { %v741_v23 = vadd.f32 %v1530_v8, %v740_v21 }
 0x62c   :  { %v780_v25 = vadd.f32 %v741_v23, %v133_v18 }
 0x62e   :  { %v796_v10 = vmax.f32 %v780_v25, 0.0 }
 0x631   :  { %v742_v24 = vpop.f32.mrf.mxu0 }
 0x632   :  { %v743_v7 = vadd.f32 %v1530_v8, %v742_v24  ;;  %v158_v24 = vadd.f32 %v1535_v22, %v1274_v54  ;;  %v165_v54 = vadd.f32 %v1535_v22, %v1280_v0 }
 0x634   :  { %v781_v9 = vadd.f32 %v743_v7, %v135_v27 }
 0x636   :  { %v797_v11 = vmax.f32 %v781_v9, 0.0 }
 0x638   :  { %v828_v15 = vpack.c.bf16 %v797_v11, %v796_v10 }
 0x639   :  { %v745_v20 = vpop.f32.mrf.mxu0 }
 0x63a   :  { %856 = vmatmul.bf16.vlgmr.msra.gmra.mxu1 %v828_v15  ;;  %v746_v28 = vadd.f32 %v1530_v8, %v745_v20 }
 0x63c   :  { %v782_v30 = vadd.f32 %v746_v28, %v138_v34  ;;  %v163_v28 = vadd.f32 %v1535_v22, %v1278_v59  ;;  %v170_v59 = vadd.f32 %v1535_v22, %v1284_v6 }
 0x63e   :  { %v798_v3 = vmax.f32 %v782_v30, 0.0 }
 0x641   :  { %v747_v29 = vpop.f32.mrf.mxu0 }
 0x642   :  { %v748_v2 = vadd.f32 %v1530_v8, %v747_v29 }
 0x644   :  { %v783_v5 = vadd.f32 %v748_v2, %v140_v63 }
 0x646   :  { %v799_v14 = vmax.f32 %v783_v5, 0.0 }
 0x648   :  { %v829_v31 = vpack.c.bf16 %v799_v14, %v798_v3 }
 0x649   :  { %v750_v32 = vpop.f32.mrf.mxu0 }
 0x64a   :  { %861 = vmatmul.bf16.gmra.mxu1 %v829_v31  ;;  %v751_v33 = vadd.f32 %v1530_v8, %v750_v32  ;;  %v168_v31 = vadd.f32 %v1535_v22, %v1282_v4 }
 0x64c   :  { %v784_v37 = vadd.f32 %v751_v33, %v143_v35 }
 0x64e   :  { %v800_v41 = vmax.f32 %v784_v37, 0.0 }
 0x651   :  { %v752_v36 = vpop.f32.mrf.mxu0 }
 0x652   :  { %v753_v16 = vadd.f32 %v1530_v8, %v752_v36 }
 0x654   :  { %v785_v26 = vadd.f32 %v753_v16, %v145_v19  ;;  %v938_v16 = vld [vmem:[%s1649_s13] ss:$0 sm:$0xff] }
 0x656   :  { %v801_v47 = vmax.f32 %v785_v26, 0.0 }
 0x658   :  { %v830_v61 = vpack.c.bf16 %v801_v47, %v800_v41 }
 0x659   :  { %v755_v12 = vpop.f32.mrf.mxu0 }
 0x65a   :  { %866 = vmatmul.bf16.gmra.mxu1 %v830_v61  ;;  %v756_v39 = vadd.f32 %v1530_v8, %v755_v12 }
 0x65c   :  { %v786_v56 = vadd.f32 %v756_v39, %v148_v62 }
 0x65e   :  { %v802_v43 = vmax.f32 %v786_v56, 0.0 }
 0x661   :  { %v757_v40 = vpop.f32.mrf.mxu0 }
 0x662   :  { %v758_v38 = vadd.f32 %v1530_v8, %v757_v40 }
 0x664   :  { %v787_v42 = vadd.f32 %v758_v38, %v150_v17 }
 0x666   :  { %v803_v44 = vmax.f32 %v787_v42, 0.0 }
 0x668   :  { %v831_v45 = vpack.c.bf16 %v803_v44, %v802_v43 }
 0x669   :  { %v760_v46 = vpop.f32.mrf.mxu0 }
 0x66a   :  { %871 = vmatmul.bf16.gmra.mxu1 %v831_v45  ;;  %v761_v50 = vadd.f32 %v1530_v8, %v760_v46 }
 0x66c   :  { %v788_v58 = vadd.f32 %v761_v50, %v153_v51 }
 0x66e   :  { %v804_v60 = vmax.f32 %v788_v58, 0.0 }
 0x671   :  { %v762_v55 = vpop.f32.mrf.mxu0 }
 0x672   :  { %v763_v53 = vadd.f32 %v1530_v8, %v762_v55 }
 0x674   :  { %v789_v13 = vadd.f32 %v763_v53, %v155_v48 }
 0x676   :  { %v805_v1 = vmax.f32 %v789_v13, 0.0 }
 0x678   :  { %v832_v21 = vpack.c.bf16 %v805_v1, %v804_v60 }
 0x679   :  { %v765_v23 = vpop.f32.mrf.mxu0 }
 0x67a   :  { %876 = vmatmul.bf16.gmra.mxu1 %v832_v21  ;;  %v766_v18 = vadd.f32 %v1530_v8, %v765_v23 }
 0x67c   :  { %v790_v25 = vadd.f32 %v766_v18, %v158_v24 }
 0x67e   :  { %v806_v9 = vmax.f32 %v790_v25, 0.0 }
 0x681   :  { %v767_v27 = vpop.f32.mrf.mxu0 }
 0x682   :  { %v768_v52 = vadd.f32 %v1530_v8, %v767_v27 }
 0x684   :  { %v791_v7 = vadd.f32 %v768_v52, %v160_v49 }
 0x686   :  { %v807_v10 = vmax.f32 %v791_v7, 0.0 }
 0x688   :  { %v833_v11 = vpack.c.bf16 %v807_v10, %v806_v9 }
 0x689   :  { %v770_v15 = vpop.f32.mrf.mxu0 }
 0x68a   :  { %881 = vmatmul.bf16.gmra.mxu1 %v833_v11  ;;  %v771_v20 = vadd.f32 %v1530_v8, %v770_v15 }
 0x68c   :  { %v792_v29 = vadd.f32 %v771_v20, %v163_v28 }
 0x68e   :  { %v808_v30 = vmax.f32 %v792_v29, 0.0 }
 0x691   :  { %v772_v34 = vpop.f32.mrf.mxu0 }
 0x692   :  { %v773_v57 = vadd.f32 %v1530_v8, %v772_v34 }
 0x694   :  { %v793_v63 = vadd.f32 %v773_v57, %v165_v54 }
 0x696   :  { %v809_v2 = vmax.f32 %v793_v63, 0.0 }
 0x698   :  { %v834_v5 = vpack.c.bf16 %v809_v2, %v808_v30 }
 0x699   :  { %v775_v3 = vpop.f32.mrf.mxu0 }
 0x69a   :  { %886 = vmatmul.bf16.gmra.mxu1 %v834_v5  ;;  %v776_v14 = vadd.f32 %v1530_v8, %v775_v3 }
 0x69c   :  { %v794_v33 = vadd.f32 %v776_v14, %v168_v31 }
 0x69e   :  { %v810_v36 = vmax.f32 %v794_v33, 0.0 }
 0x6a1   :  { %v777_v32 = vpop.f32.mrf.mxu0 }
 0x6a2   :  { %v778_v0 = vadd.f32 %v1530_v8, %v777_v32 }
 0x6a4   :  { %v795_v35 = vadd.f32 %v778_v0, %v170_v59 }
 0x6a6   :  { %v811_v19 = vmax.f32 %v795_v35, 0.0 }
 0x6a8   :  { %v835_v37 = vpack.c.bf16 %v811_v19, %v810_v36 }
 0x6aa   :  { %891 = vmatmul.bf16.gmra.mxu1 %v835_v37 }
 0x6b7   :  { %v857_v26 = vpop.f32.mrf.mxu1 }
 0x6b8   :  { %v858_v41 = vadd.f32 %v938_v16, %v857_v26 }
 0x6ba   :  { %897 = vst [vmem:[%s1650_s14] sm:$0xff] %v858_v41 }
 0x6bf   :  { %v859_v4 = vpop.f32.mrf.mxu1 }
 0x6c0   :  { %v860_v6 = vadd.f32 %v938_v16, %v859_v4 }
 0x6c2   :  { %898 = vst [vmem:[%s1650_s14 + $0x8] sm:$0xff] %v860_v6 }
 0x6c7   :  { %v862_v8 = vpop.f32.mrf.mxu1 }
 0x6c8   :  { %v863_v22 = vadd.f32 %v938_v16, %v862_v8 }
 0x6ca   :  { %899 = vst [vmem:[%s1650_s14 + $0x10] sm:$0xff] %v863_v22 }
 0x6cf   :  { %v864_v47 = vpop.f32.mrf.mxu1 }
 0x6d0   :  { %v865_v61 = vadd.f32 %v938_v16, %v864_v47 }
 0x6d2   :  { %900 = vst [vmem:[%s1650_s14 + $0x18] sm:$0xff] %v865_v61 }
 0x6d7   :  { %v867_v12 = vpop.f32.mrf.mxu1 }
 0x6d8   :  { %v868_v39 = vadd.f32 %v938_v16, %v867_v12 }
 0x6da   :  { %901 = vst [vmem:[%s1650_s14 + $0x20] sm:$0xff] %v868_v39 }
 0x6df   :  { %v869_v62 = vpop.f32.mrf.mxu1 }
 0x6e0   :  { %v870_v40 = vadd.f32 %v938_v16, %v869_v62 }
 0x6e2   :  { %902 = vst [vmem:[%s1650_s14 + $0x28] sm:$0xff] %v870_v40 }
 0x6e7   :  { %v872_v17 = vpop.f32.mrf.mxu1 }
 0x6e8   :  { %v873_v56 = vadd.f32 %v938_v16, %v872_v17 }
 0x6ea   :  { %903 = vst [vmem:[%s1650_s14 + $0x30] sm:$0xff] %v873_v56 }
 0x6ef   :  { %v874_v38 = vpop.f32.mrf.mxu1 }
 0x6f0   :  { %v875_v42 = vadd.f32 %v938_v16, %v874_v38 }
 0x6f2   :  { %904 = vst [vmem:[%s1650_s14 + $0x38] sm:$0xff] %v875_v42 }
 0x6f7   :  { %v877_v43 = vpop.f32.mrf.mxu1 }
 0x6f8   :  { %v878_v44 = vadd.f32 %v938_v16, %v877_v43 }
 0x6fa   :  { %905 = vst [vmem:[%s1650_s14 + $0x40] sm:$0xff] %v878_v44 }
 0x6ff   :  { %v879_v45 = vpop.f32.mrf.mxu1 }
 0x700   :  { %v880_v46 = vadd.f32 %v938_v16, %v879_v45 }
 0x702   :  { %906 = vst [vmem:[%s1650_s14 + $0x48] sm:$0xff] %v880_v46 }
 0x707   :  { %v882_v50 = vpop.f32.mrf.mxu1 }
 0x708   :  { %v883_v51 = vadd.f32 %v938_v16, %v882_v50 }
 0x70a   :  { %907 = vst [vmem:[%s1650_s14 + $0x50] sm:$0xff] %v883_v51 }
 0x70f   :  { %v884_v55 = vpop.f32.mrf.mxu1 }
 0x710   :  { %v885_v48 = vadd.f32 %v938_v16, %v884_v55 }
 0x712   :  { %908 = vst [vmem:[%s1650_s14 + $0x58] sm:$0xff] %v885_v48 }
 0x717   :  { %v887_v58 = vpop.f32.mrf.mxu1 }
 0x718   :  { %v888_v53 = vadd.f32 %v938_v16, %v887_v58 }
 0x71a   :  { %909 = vst [vmem:[%s1650_s14 + $0x60] sm:$0xff] %v888_v53 }
 0x71f   :  { %v889_v13 = vpop.f32.mrf.mxu1 }
 0x720   :  { %v890_v60 = vadd.f32 %v938_v16, %v889_v13 }
 0x722   :  { %910 = vst [vmem:[%s1650_s14 + $0x68] sm:$0xff] %v890_v60 }
 0x727   :  { %v892_v1 = vpop.f32.mrf.mxu1 }
 0x728   :  { %v893_v21 = vadd.f32 %v938_v16, %v892_v1 }
 0x72a   :  { %911 = vst [vmem:[%s1650_s14 + $0x70] sm:$0xff] %v893_v21 }
 0x72f   :  { %v894_v23 = vpop.f32.mrf.mxu1 }
 0x730   :  { %v895_v18 = vadd.f32 %v938_v16, %v894_v23 }
 0x732   :  { %912 = vst [vmem:[%s1650_s14 + $0x78] sm:$0xff] %v895_v18 }

</bundles_post_ra>
